<compile_context>
chip_gen: v5e
topology: v5e:2x2
jax: 0.10.0
libtpu: 0.0.40
codegen_flags: <defaults>
</compile_context>

<pallas_src>
import functools
import math

import jax
import jax.numpy as jnp
from jax.experimental import pallas as pl
from jax.experimental.pallas import tpu as pltpu


def _round_up(x, m):
    return ((x + m - 1) // m) * m


@functools.lru_cache(maxsize=1)
def _tensorcores_per_chip():
    """2 on v7x (megacore-style split can pay off), 1 on v5e/v6e/older."""
    try:
        kind = jax.devices()[0].device_kind.lower()
    except Exception:
        return 1
    return 2 if "v7" in kind else 1


def _aggregator_kernel(ops_ref, w_ref, b_ref, out_ref, acc_ref, *,
                       aggr, n_rows, row_tile, num_splits, tiles_per_split,
                       matmul_dtype, needs_mask):
    c = pl.program_id(0)          # independent split (one output row per split)
    t = pl.program_id(1)          # row-tile index inside the split (reduction)
    nt = pl.num_programs(1)

    # NOTE: 0 is a valid identity for BOTH modes only because the reduced
    # values are post-ReLU (>= 0): max(0, x) == x and the sum is unaffected by
    # masked zeros. If the activation ever changes, this init and the mask
    # below must change too.
    @pl.when(t == 0)
    def _init():
        acc_ref[...] = jnp.zeros_like(acc_ref)

    # Linear + ReLU on this row tile. ops arrives in its caller dtype (f32);
    # the cast to the MXU operand dtype is a cheap per-tile VPU op and avoids
    # any HBM pre-pass in the wrapper.
    x = ops_ref[...]
    if x.dtype != jnp.dtype(matmul_dtype):
        x = x.astype(matmul_dtype)
    g = jnp.dot(x, w_ref[...], preferred_element_type=jnp.float32)
    g = jnp.maximum(g + b_ref[...], 0.0)

    def _accumulate(vals):
        # Keep the running reduce 8 sublanes tall: per-step work is elementwise
        # VPU max/sum over 8-row slabs; the cross-sublane (XLU) reduce happens
        # exactly once, in the finalize step below.
        g3 = vals.reshape(row_tile // 8, 8, vals.shape[-1])
        if aggr == 'mean':
            acc_ref[...] += jnp.sum(g3, axis=0)
        else:  # 'max'
            acc_ref[...] = jnp.maximum(acc_ref[...], jnp.max(g3, axis=0))

    if needs_mask:
        # Only the very last row tile of the whole grid can contain rows past
        # the true N (the out-of-bounds part of that block holds unspecified
        # data). Gate the iota+compare+select on that single step; all other
        # steps stay on the cheap path.
        is_partial = jnp.logical_and(c == num_splits - 1, t == nt - 1)

        @pl.when(is_partial)
        def _masked():
            base = (c * tiles_per_split + t) * row_tile
            row_ids = base + jax.lax.broadcasted_iota(jnp.int32, (row_tile, 1), 0)
            _accumulate(jnp.where(row_ids < n_rows, g, 0.0))

        @pl.when(jnp.logical_not(is_partial))
        def _full():
            _accumulate(g)
    else:
        _accumulate(g)

    @pl.when(t == nt - 1)
    def _finalize():
        if aggr == 'mean':
            red = jnp.sum(acc_ref[...], axis=0, keepdims=True)
        else:
            red = jnp.max(acc_ref[...], axis=0, keepdims=True)
        out_ref[...] = red.reshape(out_ref.shape)


def graph_aggregator(ops, weight, bias, aggr='max', row_tile=None,
                     matmul_dtype=jnp.bfloat16):
    """ops: (N, in_dim); weight: (out_dim, in_dim); bias: (out_dim,) -> (out_dim,).

    matmul_dtype: MXU operand dtype. bf16 (default) is the fast path; pass
    jnp.float32 for closer-to-f32-PyTorch numerics (the kernel is HBM/VPU
    bound at these widths, so the cost is small).
    """
    assert aggr in ('max', 'mean')
    n, in_dim = ops.shape
    out_dim, in_dim_w = weight.shape
    assert in_dim_w == in_dim and n >= 1

    # Lane-dense output width (output stores, accumulator, post-matmul VPU work).
    out_dim_p = _round_up(out_dim, 128)

    # Row tile: ~2 MiB of ops per grid step (amortises the ~0.35 us/step
    # overhead) when N is large, but never more than one sublane group (8 rows)
    # beyond the true N for small problems.
    if row_tile is None:
        itemsize = jnp.dtype(ops.dtype).itemsize
        target = (2 * 1024 * 1024) // max(1, in_dim * itemsize)
        target = max(256, min(4096, target))
        row_tile = min(_round_up(n, 8), _round_up(target, 256))
    assert row_tile % 8 == 0

    tiles_total = -(-n // row_tile)
    needs_mask = (n % row_tile) != 0

    # 2-way split only where it can buy real concurrency (2 TensorCores) and
    # only when each split gets >=2 full tiles. Requiring an even tile count
    # keeps every tile of split 0 fully in-bounds, so the mask stays on the
    # single last tile of the whole grid.
    num_splits = 1
    if _tensorcores_per_chip() >= 2 and tiles_total >= 4 and tiles_total % 2 == 0:
        num_splits = 2
    tiles_per_split = tiles_total // num_splits

    # Grid-invariant operands are tiny: transpose/pad/cast them in the wrapper.
    # `ops` itself is passed through untouched (no HBM pre-pass).
    w_t = jnp.pad(weight.astype(jnp.float32).T,
                  ((0, 0), (0, out_dim_p - out_dim))).astype(matmul_dtype)
    b_p = jnp.pad(bias.astype(jnp.float32),
                  (0, out_dim_p - out_dim)).reshape(1, out_dim_p)

    kernel = functools.partial(
        _aggregator_kernel, aggr=aggr, n_rows=n, row_tile=row_tile,
        num_splits=num_splits, tiles_per_split=tiles_per_split,
        matmul_dtype=matmul_dtype, needs_mask=needs_mask)

    in_specs = [
        # ops row tile: walks the reduction axis; caller dtype, no padding.
        pl.BlockSpec((row_tile, in_dim),
                     lambda c, t: (c * tiles_per_split + t, 0)),
        # W^T and bias are grid-invariant and stay resident in VMEM.
        # TODO(synk): tile out_dim when in_dim*out_dim_p*itemsize exceeds the
        # VMEM budget (very large layers) instead of keeping W fully resident.
        pl.BlockSpec((in_dim, out_dim_p), lambda c, t: (0, 0)),
        pl.BlockSpec((1, out_dim_p), lambda c, t: (0, 0)),
    ]
    out_spec = pl.BlockSpec((1, 1, out_dim_p), lambda c, t: (c, 0, 0))

    # VMEM budget: double-buffered operand tiles + f32 matmul/relu/mask
    # intermediates + the in-kernel cast copy + the accumulator, with slack.
    mm_itemsize = jnp.dtype(matmul_dtype).itemsize
    vmem_bytes = (
        2 * row_tile * in_dim * jnp.dtype(ops.dtype).itemsize   # ops tiles
        + 2 * in_dim * out_dim_p * mm_itemsize                  # W^T
        + 2 * out_dim_p * 4                                     # bias
        + 2 * out_dim_p * 4                                     # out block
        + 8 * out_dim_p * 4                                     # accumulator
        + row_tile * in_dim * mm_itemsize                       # cast copy
        + 3 * row_tile * out_dim_p * 4)                         # f32 temps
    vmem_limit = int(min(48 * 1024 * 1024,
                         max(16 * 1024 * 1024,
                             1.5 * vmem_bytes + (2 << 20))))

    partials = pl.pallas_call(
        kernel,
        out_shape=jax.ShapeDtypeStruct((num_splits, 1, out_dim_p), jnp.float32),
        grid_spec=pltpu.PrefetchScalarGridSpec(
            num_scalar_prefetch=0,
            grid=(num_splits, tiles_per_split),
            in_specs=in_specs,
            out_specs=out_spec,
            scratch_shapes=[pltpu.VMEM((8, out_dim_p), jnp.float32)],
        ),
        compiler_params=pltpu.CompilerParams(
            # split axis is independent (megacore-shardable on v7x); row tiles
            # are the reduction axis.
            dimension_semantics=("parallel", "arbitrary"),
            vmem_limit_bytes=vmem_limit,
        ),
    )(ops, w_t, b_p)

    partials = partials[:, 0, :out_dim]            # (num_splits, out_dim)
    if aggr == 'mean':
        return jnp.sum(partials, axis=0) / jnp.float32(n)   # divide by true N
    return jnp.max(partials, axis=0)


if __name__ == "__main__":
    key = jax.random.PRNGKey(0)

    def init_params(k, in_dim, out_dim):
        k_w, k_b = jax.random.split(k)
        bound = 1.0 / math.sqrt(in_dim)        # nn.Linear default init range
        w = jax.random.uniform(k_w, (out_dim, in_dim), jnp.float32, -bound, bound)
        b = jax.random.uniform(k_b, (out_dim,), jnp.float32, -bound, bound)
        return w, b

    def reference(ops, w, b, aggr, cast_bf16):
        if cast_bf16:
            ops = ops.astype(jnp.bfloat16).astype(jnp.float32)
            w = w.astype(jnp.bfloat16).astype(jnp.float32)
        g = jax.nn.relu(ops @ w.T + b)
        return jnp.mean(g, axis=0) if aggr == 'mean' else jnp.max(g, axis=0)

    # (N, in_dim, out_dim, row_tile, matmul_dtype)
    #  - (8, 32, 32):     tiny graph, single 8-row tile, no masking.
    #  - (300, 64, 96):   single 304-row tile with a masked partial tail.
    #  - (1024, 128, 64): 8 row tiles -> multi-step accumulation (2-way split
    #    on v7x); f32 MXU operands exercise the no-cast path.
    configs = [
        (8, 32, 32, None, jnp.bfloat16),
        (300, 64, 96, None, jnp.bfloat16),
        (1024, 128, 64, 128, jnp.float32),
    ]
    for (N, IN_DIM, OUT_DIM, RT, MMDT) in configs:
        key, k_ops, k_par = jax.random.split(key, 3)
        w, b = init_params(k_par, IN_DIM, OUT_DIM)
        ops = jax.random.normal(k_ops, (N, IN_DIM), jnp.float32)
        for aggr in ("max", "mean"):
            out = jax.block_until_ready(
                graph_aggregator(ops, w, b, aggr=aggr, row_tile=RT,
                                 matmul_dtype=MMDT))
            assert out.shape == (OUT_DIM,), (out.shape, OUT_DIM)
            if MMDT == jnp.bfloat16:
                # Tight check against a reference using the same bf16 operands.
                ref_same = reference(ops, w, b, aggr, cast_bf16=True)
                assert jnp.allclose(out, ref_same, atol=2e-3, rtol=2e-3), (N, aggr)
                # Loose check against the full-f32 reference (bf16 rounding only).
                ref_f32 = reference(ops, w, b, aggr, cast_bf16=False)
                assert jnp.allclose(out, ref_f32, atol=5e-2, rtol=5e-2), (N, aggr)
            else:
                ref_f32 = reference(ops, w, b, aggr, cast_bf16=False)
                assert jnp.allclose(out, ref_f32, atol=2e-2, rtol=2e-2), (N, aggr)

    print("KERNEL_OK")
</pallas_src>

<mosaic_0001>
module attributes {stable_mosaic.version = 11 : i64} {
  func.func @_aggregator_kernel(%arg0: i32, %arg1: i32, %arg2: memref<8x32xf32, #tpu.memory_space<vmem>>, %arg3: memref<32x128xbf16, #tpu.memory_space<vmem>>, %arg4: memref<1x128xf32, #tpu.memory_space<vmem>>, %arg5: memref<1x1x128xf32, #tpu.memory_space<vmem>>, %arg6: memref<8x128xf32, #tpu.memory_space<vmem>>) attributes {dimension_semantics = [#tpu.dimension_semantics<parallel>, #tpu.dimension_semantics<arbitrary>], iteration_bounds = array<i64: 1, 1>, scalar_prefetch = 0 : i64, scratch_operands = 1 : i64, tpu.core_type = #tpu.core_type<tc>, window_params = [{transform_indices = @transform_0, window_bounds = array<i64: 8, 32>}, {pipeline_mode = #tpu.pipeline_mode<synchronous>, transform_indices = @transform_1, window_bounds = array<i64: 32, 128>}, {pipeline_mode = #tpu.pipeline_mode<synchronous>, transform_indices = @transform_2, window_bounds = array<i64: 1, 128>}, {transform_indices = @transform_3, window_bounds = array<i64: 1, 1, 128>}]} {
    %c0_i32 = arith.constant 0 : i32
    %0 = arith.cmpi eq, %arg1, %c0_i32 : i32
    %1 = arith.extui %0 : i1 to i32
    %c0_i32_0 = arith.constant 0 : i32
    %2 = arith.cmpi ne, %1, %c0_i32_0 : i32
    scf.if %2 {
      %cst_14 = arith.constant 0.000000e+00 : f32
      %20 = vector.broadcast %cst_14 : f32 to vector<8x128xf32>
      %c0_15 = arith.constant 0 : index
      %c0_16 = arith.constant 0 : index
      %21 = vector.load %arg6[%c0_15, %c0_16] : memref<8x128xf32, #tpu.memory_space<vmem>>, vector<8x128xf32>
      tpu.vector_store %arg6[%c0_15, %c0_16], %20 {strides = array<i32>} : memref<8x128xf32, #tpu.memory_space<vmem>>, vector<8x128xf32>,
    } else {
    }
    %c0 = arith.constant 0 : index
    %c0_1 = arith.constant 0 : index
    %3 = vector.load %arg2[%c0, %c0_1] : memref<8x32xf32, #tpu.memory_space<vmem>>, vector<8x32xf32>
    %4 = arith.truncf %3 : vector<8x32xf32> to vector<8x32xbf16>
    %c0_2 = arith.constant 0 : index
    %c0_3 = arith.constant 0 : index
    %5 = vector.load %arg3[%c0_2, %c0_3] : memref<32x128xbf16, #tpu.memory_space<vmem>>, vector<32x128xbf16>
    %cst = arith.constant dense<0.000000e+00> : vector<8x128xf32>
    %6 = tpu.matmul %4, %5, %cst {dimension_numbers = #tpu.dot_dimension_numbers<[1], [0], [0], [1], [0, 0, 1, 1], [], []>} : vector<8x32xbf16>, vector<32x128xbf16>, vector<8x128xf32> -> vector<8x128xf32>
    %c0_4 = arith.constant 0 : index
    %c0_5 = arith.constant 0 : index
    %7 = vector.load %arg4[%c0_4, %c0_5] : memref<1x128xf32, #tpu.memory_space<vmem>>, vector<1x128xf32>
    %8 = vector.broadcast %7 : vector<1x128xf32> to vector<8x128xf32>
    %9 = arith.addf %6, %8 : vector<8x128xf32>
    %cst_6 = arith.constant 0.000000e+00 : f32
    %10 = vector.broadcast %cst_6 : f32 to vector<8x128xf32>
    %11 = arith.maximumf %9, %10 : vector<8x128xf32>
    %12 = vector.shape_cast %11 : vector<8x128xf32> to vector<1x8x128xf32>
    %c0_7 = arith.constant 0 : index
    %c0_8 = arith.constant 0 : index
    %13 = vector.load %arg6[%c0_7, %c0_8] : memref<8x128xf32, #tpu.memory_space<vmem>>, vector<8x128xf32>
    %cst_9 = arith.constant dense<0xFF800000> : vector<8x128xf32>
    %14 = vector.multi_reduction <maximumf>, %12, %cst_9 [0] : vector<1x8x128xf32> to vector<8x128xf32>
    %15 = arith.maximumf %13, %14 : vector<8x128xf32>
    %c0_10 = arith.constant 0 : index
    %c0_11 = arith.constant 0 : index
    %16 = vector.load %arg6[%c0_10, %c0_11] : memref<8x128xf32, #tpu.memory_space<vmem>>, vector<8x128xf32>
    tpu.vector_store %arg6[%c0_10, %c0_11], %15 {strides = array<i32>} : memref<8x128xf32, #tpu.memory_space<vmem>>, vector<8x128xf32>,
    %c0_i32_12 = arith.constant 0 : i32
    %17 = arith.cmpi eq, %arg1, %c0_i32_12 : i32
    %18 = arith.extui %17 : i1 to i32
    %c0_i32_13 = arith.constant 0 : i32
    %19 = arith.cmpi ne, %18, %c0_i32_13 : i32
    scf.if %19 {
      %c0_14 = arith.constant 0 : index
      %c0_15 = arith.constant 0 : index
      %20 = vector.load %arg6[%c0_14, %c0_15] : memref<8x128xf32, #tpu.memory_space<vmem>>, vector<8x128xf32>
      %cst_16 = arith.constant dense<0xFF800000> : vector<128xf32>
      %21 = vector.multi_reduction <maximumf>, %20, %cst_16 [0] : vector<8x128xf32> to vector<128xf32>
      %22 = vector.shape_cast %21 : vector<128xf32> to vector<1x128xf32>
      %23 = vector.shape_cast %22 : vector<1x128xf32> to vector<1x1x128xf32>
      %c0_17 = arith.constant 0 : index
      %c0_18 = arith.constant 0 : index
      %c0_19 = arith.constant 0 : index
      %24 = vector.load %arg5[%c0_17, %c0_18, %c0_19] : memref<1x1x128xf32, #tpu.memory_space<vmem>>, vector<1x1x128xf32>
      tpu.vector_store %arg5[%c0_17, %c0_18, %c0_19], %23 {strides = array<i32>} : memref<1x1x128xf32, #tpu.memory_space<vmem>>, vector<1x1x128xf32>,
    } else {
    }
    return
  }
  func.func @transform_0(%arg0: i32, %arg1: i32) -> (i32, i32) {
    %c1_i32 = arith.constant 1 : i32
    %0 = arith.muli %arg0, %c1_i32 : i32
    %1 = arith.addi %0, %arg1 : i32
    %c0_i32 = arith.constant 0 : i32
    %c0_i32_0 = arith.constant 0 : i32
    return %1, %c0_i32 : i32, i32
  }
  func.func @transform_1(%arg0: i32, %arg1: i32) -> (i32, i32) {
    %c0_i32 = arith.constant 0 : i32
    %c0_i32_0 = arith.constant 0 : i32
    %c0_i32_1 = arith.constant 0 : i32
    return %c0_i32, %c0_i32_0 : i32, i32
  }
  func.func @transform_2(%arg0: i32, %arg1: i32) -> (i32, i32) {
    %c0_i32 = arith.constant 0 : i32
    %c0_i32_0 = arith.constant 0 : i32
    %c0_i32_1 = arith.constant 0 : i32
    return %c0_i32, %c0_i32_0 : i32, i32
  }
  func.func @transform_3(%arg0: i32, %arg1: i32) -> (i32, i32, i32) {
    %c0_i32 = arith.constant 0 : i32
    %c0_i32_0 = arith.constant 0 : i32
    %c0_i32_1 = arith.constant 0 : i32
    return %arg0, %c0_i32, %c0_i32_0 : i32, i32, i32
  }
}

</mosaic_0001>

<bundles_post_ra>
// kernel: tpu_custom_call.1
= control target key start
LH: loop header
LB: loop body
LE: loop exit
PB: predicated region body
PF: predicated region fallthrough
CT: control target
= control target key end

     0   :  { %8 = vsyncpa [#allocation4], 0  ;;  %s259_s0 = inlined_call_operand.hbm [shape: f32[8,32], index: 0, kind: input, shape index: {}]   ;;  %s260_s1 = inlined_call_operand.hbm [shape: bf16[32,128], index: 1, kind: input, shape index: {}]   ;;  %s261_s2 = inlined_call_operand.vmem [shape: f32[1,128], index: 2, kind: input, shape index: {}]   ;;  %s262_s3 = inlined_call_operand.hbm [shape: f32[1,1,128], index: 3, kind: output, shape index: {}]  }
   0x1   :  { %9 = vsyncpa [#allocation7], 0 }
   0x2   :  { %10 = vsyncpa [#allocation5], 0  ;;  %s19_s14 = sshll.u32 %s259_s0, 4  ;;  %s222_s15 = smov [#allocation3]   ;;  %s20_s14 = int_to_ptr.hbm [resolvable:$true] %s19_s14 }
   0x3   :  { %s21_s16 = sshll.u32 %s222_s15, 4  ;;  %s29_s19 = sshll.u32 %s260_s1, 4  ;;  %s22_s16 = int_to_ptr.vmem [resolvable:$true] %s21_s16  ;;  %s30_s19 = int_to_ptr.hbm [resolvable:$true] %s29_s19 }
   0x4   :  { %24 = dma.hbm_to_vmem [thread:$0]  %s20_s14, 128, %s22_s16, [#allocation4]  }
   0x5   :  { %s223_s20 = smov [#allocation6]   ;;  %s224_s22 = smov 64  }
   0x6   :  { %s31_s21 = sshll.u32 %s223_s20, 4  ;;  %s225_s23 = smov 4   ;;  %s32_s21 = int_to_ptr.vmem [resolvable:$true] %s31_s21 }
   0x7   :  { %37 = dma.hbm_to_vmem [thread:$0]  %s30_s19, 256, %s32_s21, [#allocation7], %s224_s22, %s224_s22, %s225_s23  }
   0x8   :  { %216 = dma.done.wait [#allocation4], 128  }
   0x9   :  { %217 = vsyncadd [#allocation4], 4294967168 }
   0xa   :  { %218 = dma.done.wait [#allocation7], 256  }
   0xb   :  { %219 = vsyncadd [#allocation7], 4294967040  ;;  %v137_v0 = vld [vmem:[#allocation6 + $0x8] sm:$0xff]  ;;  %v136_v1 = vld [vmem:[#allocation6] sm:$0xff]  ;;  %vm77_vm0 = vcmask 261120   ;;  %s226_s24 = smov [#allocation8]  }
   0xc   :  { %87 = vmatpush.bf16.msra.mxu0 %v137_v0  ;;  %v55_v2 = vld [vmem:[#allocation3] sm:$0xff]  ;;  %s114_s25 = sshll.u32 %s226_s24, 4  ;;  %s116_s28 = sshll.u32 %s262_s3, 4  ;;  %s115_s25 = int_to_ptr.vmem [resolvable:$true] %s114_s25  ;;  %s117_s28 = int_to_ptr.hbm [resolvable:$true] %s116_s28 }
   0xd   :  { %v56_v3 = vpack.c.bf16 %v55_v2, %v55_v2  ;;  %v143_v4 = vld [vmem:[%s261_s2] ss:$0 sm:$0xff] }
  0x10   :  { %88 = vmatpush.bf16.msra.mxu0 %v136_v1 }
  0x13   :  { %135 = vmatmul.msk.bf16.vlgmr.msra.gmra.mxu0 %vm77_vm0, %v56_v3 }
  0x90   :  { %v90_v5 = vpop.f32.mrf.mxu0 }
  0x91   :  { %v91_v6 = vadd.f32 %v143_v4, %v90_v5 }
  0x93   :  { %v94_v7 = vmax.f32 %v91_v6, 0.0 }
  0x95   :  { %v96_v8 = vmax.f32 %v94_v7, 0.0 }
  0x97   :  { %v102_v9 = vrot.slane %v96_v8, 4 }
  0x98   :  { %v92_v10 = vpop.f32.mrf.mxu0 }
  0x99   :  { %v103_v11 = vmax.f32 %v96_v8, %v102_v9 }
  0x9b   :  { %v104_v12 = vrot.slane %v103_v11, 2 }
  0x9d   :  { %v105_v13 = vmax.f32 %v103_v11, %v104_v12 }
  0x9f   :  { %v106_v14 = vrot.slane %v105_v13, 1 }
  0xa1   :  { %v107_v15 = vmax.f32 %v105_v13, %v106_v14 }
  0xa3   :  { %108 = vst [vmem:[#allocation8] sm:$0x1] %v107_v15 }
  0xa4   :  { %119 = dma.vmem_to_hbm [thread:$0]  %s115_s25, 16, %s117_s28, [#allocation5]  }
  0xa5   :  { %220 = dma.done.wait [#allocation5], 16  }
  0xa6   :  { %221 = vsyncadd [#allocation5], 4294967280 }
  0xa7   :  { %124 = vsyncpa [#allocation4], 1 }
  0xa8   :  { %125 = vsyncpa [#allocation7], 1 }
  0xa9   :  { %126 = vsyncpa [#allocation5], 1 }

</bundles_post_ra>
